<compile_context>
chip_gen: v6e
topology: v6e:2x2x1
jax: 0.10.0
libtpu: 0.0.40
codegen_flags: <defaults>
</compile_context>

<pallas_src>
import functools

import jax
import jax.numpy as jnp
from jax import lax
from jax.experimental import pallas as pl
from jax.experimental.pallas import tpu as pltpu


# Tile targets for the tiled dense kernels.  2*(tm*tk + tk*tn + tm*tn)*2B of
# bf16 double-buffered inputs + tm*tn*4B f32 accumulator stays well under the
# default scoped VMEM.  Shrink tm (or raise vmem_limit_bytes) for v7x (64 MiB).
_TM, _TN, _TK = 256, 512, 512


def _pick_tile(dim, target):
    """Largest tile <= target that divides dim (degenerates to dim when small)."""
    if dim <= target:
        return dim
    for t in range(target, 0, -1):
        if dim % t == 0:
            return t
    return dim


# ----------------------- tiled dense (+bias, +activation) -----------------------

def _dense_kernel(x_ref, w_ref, b_ref, o_ref, acc_ref, *, activation, n_k):
    k = pl.program_id(2)

    @pl.when(k == 0)
    def _():
        acc_ref[...] = jnp.zeros_like(acc_ref)

    acc_ref[...] += jnp.dot(x_ref[...], w_ref[...],
                            preferred_element_type=jnp.float32)

    @pl.when(k == n_k - 1)
    def _():
        y = acc_ref[...] + b_ref[...].astype(jnp.float32)
        if activation == "gelu":
            # TODO(synk): HF BERT uses exact erf-GELU; tanh approximation here.
            c = 0.7978845608028654  # sqrt(2/pi)
            y = 0.5 * y * (1.0 + jnp.tanh(c * (y + 0.044715 * y * y * y)))
        elif activation == "tanh":
            y = jnp.tanh(y)
        o_ref[...] = y.astype(o_ref.dtype)


def dense(x, w, b, activation="none", out_dtype=jnp.bfloat16):
    M, K = x.shape
    N = w.shape[1]
    tm, tn, tk = _pick_tile(M, _TM), _pick_tile(N, _TN), _pick_tile(K, _TK)
    n_k = K // tk
    return pl.pallas_call(
        functools.partial(_dense_kernel, activation=activation, n_k=n_k),
        out_shape=jax.ShapeDtypeStruct((M, N), out_dtype),
        grid=(M // tm, N // tn, n_k),
        in_specs=[
            pl.BlockSpec((tm, tk), lambda i, j, k: (i, k)),
            pl.BlockSpec((tk, tn), lambda i, j, k: (k, j)),
            pl.BlockSpec((1, tn), lambda i, j, k: (0, j)),
        ],
        out_specs=pl.BlockSpec((tm, tn), lambda i, j, k: (i, j)),
        scratch_shapes=[pltpu.VMEM((tm, tn), jnp.float32)],
        compiler_params=pltpu.CompilerParams(
            dimension_semantics=("parallel", "parallel", "arbitrary")),
    )(x, w, b.reshape(1, N))


# -------------- tiled dense fused with bias + residual + LayerNorm --------------

def _dense_res_ln_kernel(x_ref, w_ref, b_ref, r_ref, g_ref, bb_ref,
                         o_ref, acc_ref, *, eps, n_k):
    k = pl.program_id(1)

    @pl.when(k == 0)
    def _():
        acc_ref[...] = jnp.zeros_like(acc_ref)

    acc_ref[...] += jnp.dot(x_ref[...], w_ref[...],
                            preferred_element_type=jnp.float32)

    @pl.when(k == n_k - 1)
    def _():
        h = (acc_ref[...] + b_ref[...].astype(jnp.float32)
             + r_ref[...].astype(jnp.float32))
        mu = jnp.mean(h, axis=-1, keepdims=True)
        xc = h - mu
        var = jnp.mean(xc * xc, axis=-1, keepdims=True)
        inv = lax.rsqrt(var + eps)
        o_ref[...] = (xc * inv * g_ref[...].astype(jnp.float32)
                      + bb_ref[...].astype(jnp.float32)).astype(o_ref.dtype)


def dense_res_ln(x, w, b, residual, gamma, beta, eps=1e-12,
                 out_dtype=jnp.bfloat16):
    # Output width N is kept whole per block (needed for the LayerNorm reduce);
    # for BGE-large N=H=1024 this is a lane-dense, VMEM-friendly tile.
    M, K = x.shape
    N = w.shape[1]
    tm, tk = _pick_tile(M, _TM), _pick_tile(K, _TK)
    n_k = K // tk
    return pl.pallas_call(
        functools.partial(_dense_res_ln_kernel, eps=eps, n_k=n_k),
        out_shape=jax.ShapeDtypeStruct((M, N), out_dtype),
        grid=(M // tm, n_k),
        in_specs=[
            pl.BlockSpec((tm, tk), lambda i, k: (i, k)),
            pl.BlockSpec((tk, N), lambda i, k: (k, 0)),
            pl.BlockSpec((1, N), lambda i, k: (0, 0)),
            pl.BlockSpec((tm, N), lambda i, k: (i, 0)),
            pl.BlockSpec((1, N), lambda i, k: (0, 0)),
            pl.BlockSpec((1, N), lambda i, k: (0, 0)),
        ],
        out_specs=pl.BlockSpec((tm, N), lambda i, k: (i, 0)),
        scratch_shapes=[pltpu.VMEM((tm, N), jnp.float32)],
        compiler_params=pltpu.CompilerParams(
            dimension_semantics=("parallel", "arbitrary")),
    )(x, w, b.reshape(1, N), residual, gamma.reshape(1, N), beta.reshape(1, N))


# --------------------- LayerNorm-only kernel (embedding LN) ---------------------

def _ln_kernel(x_ref, g_ref, b_ref, o_ref, *, eps):
    h = x_ref[...].astype(jnp.float32)
    mu = jnp.mean(h, axis=-1, keepdims=True)
    xc = h - mu
    var = jnp.mean(xc * xc, axis=-1, keepdims=True)
    inv = lax.rsqrt(var + eps)
    o_ref[...] = (xc * inv * g_ref[...].astype(jnp.float32)
                  + b_ref[...].astype(jnp.float32)).astype(o_ref.dtype)


def layernorm(x, gamma, beta, eps=1e-12, out_dtype=jnp.bfloat16):
    M, H = x.shape
    tm = _pick_tile(M, _TM)
    return pl.pallas_call(
        functools.partial(_ln_kernel, eps=eps),
        out_shape=jax.ShapeDtypeStruct((M, H), out_dtype),
        grid=(M // tm,),
        in_specs=[
            pl.BlockSpec((tm, H), lambda i: (i, 0)),
            pl.BlockSpec((1, H), lambda i: (0, 0)),
            pl.BlockSpec((1, H), lambda i: (0, 0)),
        ],
        out_specs=pl.BlockSpec((tm, H), lambda i: (i, 0)),
        compiler_params=pltpu.CompilerParams(
            dimension_semantics=("parallel",)),
    )(x, gamma.reshape(1, H), beta.reshape(1, H))


# ---------------------- multi-head attention on fused QKV ----------------------

def _mha_kernel(q_ref, k_ref, v_ref, bias_ref, o_ref, *, nh, hd, scale):
    # One batch element per grid step; q/k/v refs are the (1, S, H) slices of
    # the fused QKV projection (selected by BlockSpec — no XLA transposes).
    bias = bias_ref[0]                          # (1, S) additive mask bias, f32
    for h in range(nh):                         # static unroll over heads
        lo, hi = h * hd, (h + 1) * hd
        q = q_ref[0, :, lo:hi]                  # (S, hd) bf16
        k = k_ref[0, :, lo:hi]
        v = v_ref[0, :, lo:hi]
        # q @ k^T via dot_general contracting on hd (no explicit XLU transpose)
        s = lax.dot_general(q, k, (((1,), (1,)), ((), ())),
                            preferred_element_type=jnp.float32) * scale
        s = s + bias
        m = jnp.max(s, axis=-1, keepdims=True)
        p = jnp.exp(s - m)
        l = jnp.sum(p, axis=-1, keepdims=True)
        p = p * pl.reciprocal(l, approx=True)   # EUP slot, not a VPU divide
        out = jnp.dot(p.astype(v.dtype), v, preferred_element_type=jnp.float32)
        o_ref[0, :, lo:hi] = out.astype(o_ref.dtype)


def attention(qkv, mask_bias, nh, hd):
    # qkv: (B, S, 3H) fused projection output, layout [q | k | v] on last axis.
    # TODO(synk): no flash-style tiling over S; whole sequence per block (fine
    # for BGE's S <= 512).
    B, S, three_h = qkv.shape
    H = nh * hd
    assert three_h == 3 * H
    scale = 1.0 / float(hd) ** 0.5
    q_spec = pl.BlockSpec((1, S, H), lambda b: (b, 0, 0))
    k_spec = pl.BlockSpec((1, S, H), lambda b: (b, 0, 1))
    v_spec = pl.BlockSpec((1, S, H), lambda b: (b, 0, 2))
    return pl.pallas_call(
        functools.partial(_mha_kernel, nh=nh, hd=hd, scale=scale),
        out_shape=jax.ShapeDtypeStruct((B, S, H), qkv.dtype),
        grid=(B,),
        in_specs=[q_spec, k_spec, v_spec,
                  pl.BlockSpec((1, 1, S), lambda b: (b, 0, 0))],
        out_specs=pl.BlockSpec((1, S, H), lambda b: (b, 0, 0)),
        compiler_params=pltpu.CompilerParams(
            dimension_semantics=("parallel",)),
    )(qkv, qkv, qkv, mask_bias)


# ------------------------------ parameter creation ------------------------------

def init_params(key, vocab, max_pos, hidden, n_layers, n_heads, inter):
    del n_heads  # head count handled by the caller
    std = 0.02
    wdt = jnp.bfloat16  # MXU weights in bf16
    keys = jax.random.split(key, 4 + n_layers)
    params = {
        "word_emb": jax.random.normal(keys[0], (vocab, hidden), jnp.float32) * std,
        "pos_emb": jax.random.normal(keys[1], (max_pos, hidden), jnp.float32) * std,
        "type_emb": jax.random.normal(keys[2], (2, hidden), jnp.float32) * std,
        "emb_ln_g": jnp.ones((hidden,), jnp.float32),
        "emb_ln_b": jnp.zeros((hidden,), jnp.float32),
        "pooler_w": (jax.random.normal(keys[3], (hidden, hidden)) * std).astype(wdt),
        "pooler_b": jnp.zeros((hidden,), jnp.float32),
        "layers": [],
    }
    for li in range(n_layers):
        lk = jax.random.split(keys[4 + li], 4)
        layer = {
            # fused Q|K|V projection: one (H, 3H) matmul instead of three
            "wqkv": (jax.random.normal(lk[0], (hidden, 3 * hidden)) * std).astype(wdt),
            "bqkv": jnp.zeros((3 * hidden,), jnp.float32),
            "wo": (jax.random.normal(lk[1], (hidden, hidden)) * std).astype(wdt),
            "bo": jnp.zeros((hidden,), jnp.float32),
            "ln1_g": jnp.ones((hidden,), jnp.float32),
            "ln1_b": jnp.zeros((hidden,), jnp.float32),
            "wi": (jax.random.normal(lk[2], (hidden, inter)) * std).astype(wdt),
            "bi": jnp.zeros((inter,), jnp.float32),
            "wf": (jax.random.normal(lk[3], (inter, hidden)) * std).astype(wdt),
            "bf": jnp.zeros((hidden,), jnp.float32),
            "ln2_g": jnp.ones((hidden,), jnp.float32),
            "ln2_b": jnp.zeros((hidden,), jnp.float32),
        }
        params["layers"].append(layer)
    return params


# --------------------------------- forward pass ---------------------------------

def model_forward(params, input_ids, n_heads, encoder_type="cls"):
    B, S = input_ids.shape
    H = params["word_emb"].shape[1]
    hd = H // n_heads

    # attention_mask = torch.ne(input_ids, 0) -> additive bias (B, 1, S)
    mask_bias = jnp.where(input_ids != 0, 0.0, -1e9).astype(jnp.float32)[:, None, :]

    # Embeddings (gather is XLA glue) + LayerNorm (Pallas, no zeros residual).
    # TODO(synk): token_type_ids assumed all-zero (only type_emb[0] is added).
    emb = (jnp.take(params["word_emb"], input_ids, axis=0)
           + params["pos_emb"][None, :S, :]
           + params["type_emb"][0][None, None, :])
    x = layernorm(emb.reshape(B * S, H).astype(jnp.float32),
                  params["emb_ln_g"], params["emb_ln_b"])          # (B*S, H) bf16

    first_layer_out = None                                         # hidden_states[1]
    for li, layer in enumerate(params["layers"]):
        # fused QKV projection -> (B*S, 3H)
        qkv = dense(x, layer["wqkv"], layer["bqkv"])
        # attention directly on the fused output (no head transposes in XLA)
        ctx = attention(qkv.reshape(B, S, 3 * H), mask_bias, n_heads, hd)
        # output projection + residual + LayerNorm, fused
        x = dense_res_ln(ctx.reshape(B * S, H), layer["wo"], layer["bo"],
                         x, layer["ln1_g"], layer["ln1_b"])
        # FFN: up-projection + GELU, then down-projection + residual + LN (fused)
        h1 = dense(x, layer["wi"], layer["bi"], activation="gelu")
        x = dense_res_ln(h1, layer["wf"], layer["bf"],
                         x, layer["ln2_g"], layer["ln2_b"])
        if li == 0:
            first_layer_out = x

    last = x.reshape(B, S, H).astype(jnp.float32)

    if encoder_type == "fist-last-avg":
        # NOTE: like the PyTorch reference (avg_pool1d), padding is NOT masked.
        first = first_layer_out.reshape(B, S, H).astype(jnp.float32)
        return 0.5 * (jnp.mean(first, axis=1) + jnp.mean(last, axis=1))
    if encoder_type == "last-avg":
        return jnp.mean(last, axis=1)
    if encoder_type == "cls":
        return last[:, 0]
    if encoder_type == "pooler":
        cls = last[:, 0].astype(jnp.bfloat16)
        return dense(cls, params["pooler_w"], params["pooler_b"],
                     activation="tanh", out_dtype=jnp.float32)
    raise ValueError(encoder_type)


# -------------------------------------- main --------------------------------------

if __name__ == "__main__":
    # Small but alignment-friendly config: head_dim = 128 keeps every block and
    # in-kernel head slice lane-aligned.
    VOCAB, MAX_POS, HIDDEN, LAYERS, HEADS, INTER = 128, 64, 256, 2, 2, 512
    B, S = 2, 8

    key = jax.random.PRNGKey(0)
    params = init_params(key, VOCAB, MAX_POS, HIDDEN, LAYERS, HEADS, INTER)

    ids_key = jax.random.fold_in(key, 999)
    input_ids = jax.random.randint(ids_key, (B, S), 1, VOCAB, dtype=jnp.int32)
    input_ids = input_ids.at[1, -2:].set(0)   # padding tokens -> masked out

    out = model_forward(params, input_ids, HEADS, encoder_type="cls")
    out = jax.block_until_ready(out)
    assert out.shape == (B, HIDDEN) and out.dtype == jnp.float32
    print("KERNEL_OK")
</pallas_src>

<mosaic_0001>
module attributes {stable_mosaic.version = 11 : i64} {
  func.func @_ln_kernel(%arg0: i32, %arg1: memref<16x256xf32, #tpu.memory_space<vmem>>, %arg2: memref<1x256xf32, #tpu.memory_space<vmem>>, %arg3: memref<1x256xf32, #tpu.memory_space<vmem>>, %arg4: memref<16x256xbf16, #tpu.memory_space<vmem>>) attributes {dimension_semantics = [#tpu.dimension_semantics<parallel>], iteration_bounds = array<i64: 1>, scalar_prefetch = 0 : i64, scratch_operands = 0 : i64, tpu.core_type = #tpu.core_type<tc>, window_params = [{transform_indices = @transform_0, window_bounds = array<i64: 16, 256>}, {pipeline_mode = #tpu.pipeline_mode<synchronous>, transform_indices = @transform_1, window_bounds = array<i64: 1, 256>}, {pipeline_mode = #tpu.pipeline_mode<synchronous>, transform_indices = @transform_2, window_bounds = array<i64: 1, 256>}, {transform_indices = @transform_3, window_bounds = array<i64: 16, 256>}]} {
    %c0 = arith.constant 0 : index
    %c0_0 = arith.constant 0 : index
    %0 = vector.load %arg1[%c0, %c0_0] : memref<16x256xf32, #tpu.memory_space<vmem>>, vector<16x256xf32>
    %cst = arith.constant dense<0.000000e+00> : vector<16xf32>
    %1 = vector.multi_reduction <add>, %0, %cst [1] : vector<16x256xf32> to vector<16xf32>
    %2 = vector.shape_cast %1 : vector<16xf32> to vector<16x1xf32>
    %cst_1 = arith.constant 2.560000e+02 : f32
    %3 = vector.broadcast %cst_1 : f32 to vector<16x1xf32>
    %4 = arith.divf %2, %3 : vector<16x1xf32>
    %5 = vector.broadcast %4 : vector<16x1xf32> to vector<16x256xf32>
    %6 = arith.subf %0, %5 : vector<16x256xf32>
    %7 = arith.mulf %6, %6 : vector<16x256xf32>
    %cst_2 = arith.constant dense<0.000000e+00> : vector<16xf32>
    %8 = vector.multi_reduction <add>, %7, %cst_2 [1] : vector<16x256xf32> to vector<16xf32>
    %9 = vector.shape_cast %8 : vector<16xf32> to vector<16x1xf32>
    %cst_3 = arith.constant 2.560000e+02 : f32
    %10 = vector.broadcast %cst_3 : f32 to vector<16x1xf32>
    %11 = arith.divf %9, %10 : vector<16x1xf32>
    %cst_4 = arith.constant 9.99999996E-13 : f32
    %12 = vector.broadcast %cst_4 : f32 to vector<16x1xf32>
    %13 = arith.addf %11, %12 : vector<16x1xf32>
    %14 = math.rsqrt %13 : vector<16x1xf32>
    %15 = vector.broadcast %14 : vector<16x1xf32> to vector<16x256xf32>
    %16 = arith.mulf %6, %15 : vector<16x256xf32>
    %c0_5 = arith.constant 0 : index
    %c0_6 = arith.constant 0 : index
    %17 = vector.load %arg2[%c0_5, %c0_6] : memref<1x256xf32, #tpu.memory_space<vmem>>, vector<1x256xf32>
    %18 = vector.broadcast %17 : vector<1x256xf32> to vector<16x256xf32>
    %19 = arith.mulf %16, %18 : vector<16x256xf32>
    %c0_7 = arith.constant 0 : index
    %c0_8 = arith.constant 0 : index
    %20 = vector.load %arg3[%c0_7, %c0_8] : memref<1x256xf32, #tpu.memory_space<vmem>>, vector<1x256xf32>
    %21 = vector.broadcast %20 : vector<1x256xf32> to vector<16x256xf32>
    %22 = arith.addf %19, %21 : vector<16x256xf32>
    %23 = arith.truncf %22 : vector<16x256xf32> to vector<16x256xbf16>
    %c0_9 = arith.constant 0 : index
    %c0_10 = arith.constant 0 : index
    %24 = vector.load %arg4[%c0_9, %c0_10] : memref<16x256xbf16, #tpu.memory_space<vmem>>, vector<16x256xbf16>
    tpu.vector_store %arg4[%c0_9, %c0_10], %23 {strides = array<i32>} : memref<16x256xbf16, #tpu.memory_space<vmem>>, vector<16x256xbf16>,
    return
  }
  func.func @transform_0(%arg0: i32) -> (i32, i32) {
    %c0_i32 = arith.constant 0 : i32
    %c0_i32_0 = arith.constant 0 : i32
    return %arg0, %c0_i32 : i32, i32
  }
  func.func @transform_1(%arg0: i32) -> (i32, i32) {
    %c0_i32 = arith.constant 0 : i32
    %c0_i32_0 = arith.constant 0 : i32
    %c0_i32_1 = arith.constant 0 : i32
    return %c0_i32, %c0_i32_0 : i32, i32
  }
  func.func @transform_2(%arg0: i32) -> (i32, i32) {
    %c0_i32 = arith.constant 0 : i32
    %c0_i32_0 = arith.constant 0 : i32
    %c0_i32_1 = arith.constant 0 : i32
    return %c0_i32, %c0_i32_0 : i32, i32
  }
  func.func @transform_3(%arg0: i32) -> (i32, i32) {
    %c0_i32 = arith.constant 0 : i32
    %c0_i32_0 = arith.constant 0 : i32
    return %arg0, %c0_i32 : i32, i32
  }
}

</mosaic_0001>

<bundles_post_ra>
// kernel: tpu_custom_call.1
= control target key start
LH: loop header
LB: loop body
LE: loop exit
PB: predicated region body
PF: predicated region fallthrough
CT: control target
= control target key end

     0   :  { %8 = vsyncpa [#allocation3], 0  ;;  %s262_s0 = inlined_call_operand.hbm [shape: f32[16,256], index: 0, kind: input, shape index: {}]   ;;  %s263_s1 = inlined_call_operand.hbm [shape: f32[1,256], index: 1, kind: input, shape index: {}]   ;;  %s264_s2 = inlined_call_operand.vmem [shape: f32[1,256], index: 2, kind: input, shape index: {}]   ;;  %s265_s3 = inlined_call_operand.hbm [shape: bf16[16,256], index: 3, kind: output, shape index: {}]  }
   0x1   :  { %9 = vsyncpa [#allocation6], 0 }
   0x2   :  { %10 = vsyncpa [#allocation4], 0  ;;  %s223_s12 = smov [#allocation2]  }
   0x3   :  { %s16_s13 = sshll.u32 %s223_s12, 4  ;;  %s17_s13 = int_to_ptr.vmem [resolvable:$true] %s16_s13 }
   0x4   :  { %s165_s14 = scalar_lea.vmem %s17_s13, 512  ;;  %p170_p1 = scmp.lt.s32.totalorder %s17_s13, %s17_s13 }
   0x5   :  { %p166_p0 = scmp.ne.s32.totalorder %s17_s13, %s165_s14  ;;  %p171_p2 = scmp.lt.s32.totalorder %s165_s14, %s165_s14 }
   0x7   :  { %p172_p3 = por %p171_p2, %p170_p1 }
   0x9   :  { %p173_p4 = pnand %p172_p3, %p166_p0 }
   0xb   :  { %176 = shalt.err (!%p173_p4)
}
   0xc   :  { %s224_s15 = smov 256   ;;  %s225_s16 = smov 16  }
   0xd   :  { %22 = dma.hbm_to_vmem [thread:$0]  %s262_s0, 512, %s17_s13, [#allocation3], %s224_s15, %s224_s15, %s225_s16  }
   0xe   :  { %s226_s19 = smov [#allocation5]  }
   0xf   :  { %s29_s20 = sshll.u32 %s226_s19, 4  ;;  %s30_s20 = int_to_ptr.vmem [resolvable:$true] %s29_s20 }
  0x10   :  { %s185_s21 = scalar_lea.vmem %s30_s20, 32  ;;  %p190_p6 = scmp.lt.s32.totalorder %s30_s20, %s30_s20 }
  0x11   :  { %p186_p5 = scmp.ne.s32.totalorder %s30_s20, %s185_s21  ;;  %p191_p7 = scmp.lt.s32.totalorder %s185_s21, %s185_s21 }
  0x13   :  { %p192_p8 = por %p191_p7, %p190_p6 }
  0x15   :  { %p193_p9 = pnand %p192_p8, %p186_p5 }
  0x17   :  { %196 = shalt.err (!%p193_p9)
}
  0x18   :  { %32 = dma.hbm_to_vmem [thread:$0]  %s263_s1, 32, %s30_s20, [#allocation6]  }
  0x19   :  { %217 = dma.done.wait [#allocation3], 512  }
  0x1a   :  { %218 = vsyncadd [#allocation3], 4294966784 }
  0x1b   :  { %219 = dma.done.wait [#allocation6], 32  }
  0x1c   :  { %220 = vsyncadd [#allocation6], 4294967264  ;;  %v41_v0 = vld [vmem:[#allocation2] sm:$0xff]  ;;  %v42_v1 = vld [vmem:[#allocation2 + $0x8] sm:$0xff]  ;;  %v80_v25 = vlaneseq  ;;  %s227_s24 = smov [#allocation7]  }
  0x1d   :  { %v43_v2 = vld [vmem:[#allocation2 + $0x10] sm:$0xff]  ;;  %v45_v3 = vadd.f32 %v42_v1, %v41_v0  ;;  %v44_v4 = vld [vmem:[#allocation2 + $0x18] sm:$0xff]  ;;  %v78_v30 = vld [vmem:[#allocation5] sm:$0x3]  ;;  %s129_s25 = sshll.u32 %s227_s24, 4  ;;  %s130_s25 = int_to_ptr.vmem [resolvable:$true] %s129_s25 }
  0x1e   :  { %v48_v5 = vadd.f32 %v44_v4, %v43_v2  ;;  %v81_v27 = vshrl.u32 %v80_v25, 7  ;;  %v94_v31 = vld [vmem:[%s264_s2] sm:$0x3]  ;;  %s197_s2 = scalar_lea.vmem %s130_s25, 256  ;;  %p202_p11 = scmp.lt.s32.totalorder %s130_s25, %s130_s25 }
  0x1f   :  { %46 = vadd.xlane.f32.xlu0 %v45_v3  ;;  %p198_p10 = scmp.ne.s32.totalorder %s130_s25, %s197_s2  ;;  %p203_p12 = scmp.lt.s32.totalorder %s197_s2, %s197_s2 }
  0x20   :  { %v82_v28 = vsub.s32 0, %v81_v27  ;;  %v86_v29 = vsub.s32 1, %v81_v27 }
  0x21   :  { %p204_p13 = por %p203_p12, %p202_p11 }
  0x22   :  { %v83_v32 = vrot.slane %v78_v30, %v82_v28  ;;  %v87_v33 = vrot.slane %v78_v30, %v86_v29  ;;  %v99_v37 = vrot.slane %v94_v31, %v82_v28  ;;  %v103_v38 = vrot.slane %v94_v31, %v86_v29 }
  0x23   :  { %49 = vadd.xlane.f32.xlu0 %v48_v5  ;;  %p205_p0 = pnand %p204_p13, %p198_p10 }
  0xa8   :  { %v47_v6 = vpop.xlane.xlu0 %46 }
  0xa9   :  { %v52_v7 = vmul.f32 0.00390625, %v47_v6 }
  0xab   :  { %v54_v8 = vsub.f32 %v41_v0, %v52_v7  ;;  %v55_v9 = vsub.f32 %v42_v1, %v52_v7 }
  0xac   :  { %v50_v10 = vpop.xlane.xlu0 %49 }
  0xad   :  { %v53_v11 = vmul.f32 0.00390625, %v50_v10  ;;  %v58_v12 = vmul.f32 %v54_v8, %v54_v8  ;;  %v59_v13 = vmul.f32 %v55_v9, %v55_v9 }
  0xaf   :  { %v56_v14 = vsub.f32 %v43_v2, %v53_v11  ;;  %v57_v15 = vsub.f32 %v44_v4, %v53_v11  ;;  %v62_v16 = vadd.f32 %v59_v13, %v58_v12 }
  0xb1   :  { %63 = vadd.xlane.f32.xlu1 %v62_v16  ;;  %v60_v17 = vmul.f32 %v56_v14, %v56_v14  ;;  %v61_v18 = vmul.f32 %v57_v15, %v57_v15 }
  0xb3   :  { %v65_v19 = vadd.f32 %v61_v18, %v60_v17 }
  0xb5   :  { %66 = vadd.xlane.f32.xlu1 %v65_v19 }
 0x13a   :  { %v64_v20 = vpop.xlane.xlu1 %63 }
 0x13b   :  { %v68_v21 = vmul.f32 0.00390625, %v64_v20 }
 0x13d   :  { %v70_v22 = vadd.f32 1e-12, %v68_v21 }
 0x13e   :  { %v67_v23 = vpop.xlane.xlu1 %66 }
 0x13f   :  { %153 = vrsqrt.f32 %v70_v22  ;;  %v69_v24 = vmul.f32 0.00390625, %v67_v23 }
 0x141   :  { %v71_v26 = vadd.f32 1e-12, %v69_v24 }
 0x143   :  { %155 = vrsqrt.f32 %v71_v26 }
 0x14c   :  { %v154_v34 = vpop.eup %153 }
 0x14d   :  { %v74_v35 = vmul.f32 %v154_v34, %v54_v8  ;;  %v75_v36 = vmul.f32 %v154_v34, %v55_v9 }
 0x14f   :  { %v90_v39 = vmul.f32 %v83_v32, %v74_v35  ;;  %v91_v40 = vmul.f32 %v87_v33, %v75_v36 }
 0x150   :  { %v156_v41 = vpop.eup %155 }
 0x151   :  { %v76_v42 = vmul.f32 %v156_v41, %v56_v14  ;;  %v77_v43 = vmul.f32 %v156_v41, %v57_v15  ;;  %v106_v44 = vadd.f32 %v99_v37, %v90_v39  ;;  %v107_v45 = vadd.f32 %v103_v38, %v91_v40 }
 0x153   :  { %v92_v46 = vmul.f32 %v83_v32, %v76_v42  ;;  %v93_v47 = vmul.f32 %v87_v33, %v77_v43  ;;  %v144_v48 = vpack.c.bf16 %v107_v45, %v106_v44 }
 0x155   :  { %v108_v49 = vadd.f32 %v99_v37, %v92_v46  ;;  %v109_v50 = vadd.f32 %v103_v38, %v93_v47  ;;  %122 = vst [vmem:[#allocation7] sm:$0xff] %v144_v48 }
 0x157   :  { %v145_v51 = vpack.c.bf16 %v109_v50, %v108_v49 }
 0x159   :  { %123 = vst [vmem:[#allocation7 + $0x8] sm:$0xff] %v145_v51 }
 0x15a   :  { %208 = shalt.err (!%p205_p0)
}
 0x15b   :  { %s228_s26 = smov 128   ;;  %s229_s27 = smov 8  }
 0x15c   :  { %135 = dma.vmem_to_hbm [thread:$0]  %s130_s25, 256, %s265_s3, [#allocation4], %s228_s26, %s228_s26, %s229_s27  }
 0x15d   :  { %221 = dma.done.wait [#allocation4], 256  }
 0x15e   :  { %222 = vsyncadd [#allocation4], 4294967040 }
 0x15f   :  { %139 = vsyncpa [#allocation3], 1 }
 0x160   :  { %140 = vsyncpa [#allocation6], 1 }
 0x161   :  { %141 = vsyncpa [#allocation4], 1 }

</bundles_post_ra>
